<compile_context>
chip_gen: v7x
topology: tpu7x:2x2x1
jax: 0.10.0
libtpu: 0.0.40
codegen_flags: <defaults>
</compile_context>

<pallas_src>
import functools

import jax
import jax.numpy as jnp
from jax.experimental import pallas as pl
from jax.experimental.pallas import tpu as pltpu

EPS = 1e-12
LANE = 128  # lane-dense feature alignment (256 would also fill v6e/v7x MXU tiles)


def _round_up(x, n):
    return (x + n - 1) // n * n


def _vmem_capacity_bytes():
    try:
        return int(pltpu.get_tpu_info().vmem_capacity_bytes)
    except Exception:
        return 64 * 1024 * 1024  # conservative (v7x per-TC VMEM)


def _resident_spec(block_shape, index_map):
    # Resident operand (constant index_map): single VMEM buffer -> no wasted
    # double-buffer copy of the weights.
    try:
        return pl.BlockSpec(block_shape, index_map, pipeline_mode=pl.Buffered(1))
    except Exception:  # older jax without pipeline_mode/Buffered
        return pl.BlockSpec(block_shape, index_map)


def _gelu_exact(x):
    # Matches torch.nn.functional.gelu default (erf-based). Runs on the EUP.
    return 0.5 * x * (1.0 + jax.lax.erf(x * (1.0 / jnp.sqrt(2.0).astype(x.dtype))))


def _layer_norm_padded(x, gamma, beta, *, h_true, n_pad):
    # PyTorch LayerNorm (biased variance, eps=1e-12) over the TRUE feature
    # width.  Padded columns of x are exactly zero, so sum(x) is unaffected;
    # the centered sum of squares picks up n_pad * mean^2 from the pad
    # columns, which we subtract.
    s = jnp.sum(x, axis=-1, keepdims=True)
    mean = s * (1.0 / h_true)
    xc = x - mean
    ss = jnp.sum(xc * xc, axis=-1, keepdims=True)
    if n_pad:
        ss = ss - n_pad * (mean * mean)
    var = ss * (1.0 / h_true)
    inv = jax.lax.rsqrt(var + EPS)
    return xc * inv * gamma + beta


def _mlp_ln_kernel(x_ref, w1_ref, w2_ref, p_ref, o_ref, *, h_true, n_pad):
    # x_ref: (TM, D_pad) tile; w1/w2: resident weights; p_ref: (6, H_pad) packed
    # {b1, g1, be1, b2, g2, be2} in f32; o_ref: (TM, H_pad) output tile.
    x = x_ref[...]
    w1 = w1_ref[...]
    w2 = w2_ref[...]
    # Static ref-level slices (free) instead of sublane-extracting a loaded value.
    b1, g1, be1 = p_ref[0:1, :], p_ref[1:2, :], p_ref[2:3, :]
    b2, g2, be2 = p_ref[3:4, :], p_ref[4:5, :], p_ref[5:6, :]

    # Linear1 -> gelu -> LayerNorm1 (f32 accumulation on the MXU).
    h = jnp.dot(x, w1, preferred_element_type=jnp.float32) + b1
    h = _gelu_exact(h)
    h = _layer_norm_padded(h, g1, be1, h_true=h_true, n_pad=n_pad)

    # Linear2 -> gelu -> LayerNorm2.  Cast the f32 intermediate to the weight
    # dtype so a bf16 weight path keeps feeding the MXU bf16 operands.
    h = jnp.dot(h.astype(w2.dtype), w2, preferred_element_type=jnp.float32) + b2
    h = _gelu_exact(h)
    h = _layer_norm_padded(h, g2, be2, h_true=h_true, n_pad=n_pad)

    o_ref[...] = h.astype(o_ref.dtype)


@functools.partial(jax.jit, static_argnames=("tm", "use_bf16_matmul", "out_dtype"))
def mlp_with_layer_norm(hidden, params, *, tm=None, use_bf16_matmul=False,
                        out_dtype=None):
    """hidden: (batch, seq, input_size). Returns (batch, seq, hidden_size).

    tm: row-tile size (None -> derived per chip: ~256 on v7x, ~512 on v5e/v6e).
    use_bf16_matmul: feed the MXU bf16 operands (f32 accumulation) on all
        generations (v5e MXU is natively bf16).  Elementwise math stays f32.
    out_dtype: output dtype (default = input dtype); bf16 halves the output
        writeback stream if downstream accepts it.
    """
    w1, b1, g1, be1, w2, b2, g2, be2 = params
    batch, seq, d_in = hidden.shape
    h_dim = w1.shape[1]
    m = batch * seq
    out_dtype = hidden.dtype if out_dtype is None else out_dtype

    vmem_cap = _vmem_capacity_bytes()

    # ---- feature-dim padding (lane-dense last dims; no-op when aligned). ----
    d_pad = _round_up(d_in, LANE)
    h_pad = _round_up(h_dim, LANE)

    x2d = hidden.reshape(m, d_in)
    if d_pad > d_in:
        x2d = jnp.pad(x2d, ((0, 0), (0, d_pad - d_in)))
    if d_pad > d_in or h_pad > h_dim:
        w1 = jnp.pad(w1, ((0, d_pad - d_in), (0, h_pad - h_dim)))
    if h_pad > h_dim:
        w2 = jnp.pad(w2, ((0, h_pad - h_dim), (0, h_pad - h_dim)))
        pad_vec = lambda v: jnp.pad(v, (0, h_pad - h_dim))
        b1, g1, be1 = pad_vec(b1), pad_vec(g1), pad_vec(be1)
        b2, g2, be2 = pad_vec(b2), pad_vec(g2), pad_vec(be2)

    # Pack the six (H,) parameter vectors into one resident (6, H_pad) f32 block.
    packed = jnp.stack([b1, g1, be1, b2, g2, be2], axis=0).astype(jnp.float32)

    if use_bf16_matmul:
        x2d = x2d.astype(jnp.bfloat16)
        w1c = w1.astype(jnp.bfloat16)
        w2c = w2.astype(jnp.bfloat16)
    else:
        w1c, w2c = w1, w2

    # ---- row tiling: pick tm dividing the (sublane-aligned) row count. ----
    row_align = 16 if x2d.dtype == jnp.bfloat16 else 8
    m_pad = _round_up(m, row_align)

    if tm is None:
        # v7x (64 MiB VMEM/TC): smaller tile; v5e/v6e (128 MiB): larger.
        tm_target = 256 if vmem_cap <= 80 * 1024 * 1024 else 512
        upper = min(tm_target, m_pad)
        if m_pad >= 2 * row_align:
            upper = min(upper, m_pad // 2)  # >=2 tiles -> both v7x TCs busy
    else:
        upper = min(tm, m_pad)
    upper = max(upper, row_align)

    tm_eff = row_align
    for cand in range(upper, row_align - 1, -1):
        if cand % row_align == 0 and m_pad % cand == 0:
            tm_eff = cand
            break
    n_tiles = m_pad // tm_eff

    if m_pad > m:  # ragged row fallback only (no HBM round-trip when aligned)
        x2d = jnp.pad(x2d, ((0, m_pad - m), (0, 0)))

    # ---- VMEM budget & cost hints (derived from the actual chip). ----
    x_bytes = x2d.dtype.itemsize
    w_bytes = w1c.dtype.itemsize
    o_bytes = jnp.dtype(out_dtype).itemsize

    vmem_est = (
        (d_pad * h_pad + h_pad * h_pad) * w_bytes   # resident weights (1 buffer)
        + 6 * h_pad * 4                             # packed params
        + 2 * tm_eff * d_pad * x_bytes              # double-buffered x tiles
        + 2 * tm_eff * h_pad * o_bytes              # double-buffered out tiles
        + 6 * tm_eff * h_pad * 4                    # f32 intermediates headroom
    )
    vmem_limit = int(min(0.9 * vmem_cap,
                         max(vmem_est * 3 // 2, 16 * 1024 * 1024)))
    vmem_limit = max(vmem_limit, 4 * 1024 * 1024)

    cost = pl.CostEstimate(
        flops=2 * m_pad * (d_pad + h_pad) * h_pad,
        transcendentals=2 * m_pad * h_pad,
        bytes_accessed=(m_pad * d_pad * x_bytes + m_pad * h_pad * o_bytes
                        + (d_pad * h_pad + h_pad * h_pad) * w_bytes
                        + 6 * h_pad * 4),
    )

    kernel = functools.partial(_mlp_ln_kernel, h_true=h_dim, n_pad=h_pad - h_dim)

    out2d = pl.pallas_call(
        kernel,
        out_shape=jax.ShapeDtypeStruct((m_pad, h_pad), out_dtype),
        grid=(n_tiles,),
        in_specs=[
            pl.BlockSpec((tm_eff, d_pad), lambda i: (i, 0)),     # x tile (streamed)
            _resident_spec((d_pad, h_pad), lambda i: (0, 0)),    # w1 (resident)
            _resident_spec((h_pad, h_pad), lambda i: (0, 0)),    # w2 (resident)
            _resident_spec((6, h_pad), lambda i: (0, 0)),        # packed b/gamma/beta
        ],
        out_specs=pl.BlockSpec((tm_eff, h_pad), lambda i: (i, 0)),
        compiler_params=pltpu.CompilerParams(
            dimension_semantics=("parallel",),
            vmem_limit_bytes=vmem_limit,
        ),
        cost_estimate=cost,
    )(x2d, w1c, w2c, packed)

    if m_pad > m or h_pad > h_dim:
        out2d = out2d[:m, :h_dim]
    return out2d.reshape(batch, seq, h_dim)


def init_params(key, input_size, hidden_size):
    """Deterministic init mimicking nn.Linear defaults; LN gamma=1, beta=0."""
    k1, k2, k3, k4 = jax.random.split(key, 4)
    lim1 = 1.0 / jnp.sqrt(input_size)
    lim2 = 1.0 / jnp.sqrt(hidden_size)
    w1 = jax.random.uniform(k1, (input_size, hidden_size), jnp.float32, -lim1, lim1)
    b1 = jax.random.uniform(k2, (hidden_size,), jnp.float32, -lim1, lim1)
    w2 = jax.random.uniform(k3, (hidden_size, hidden_size), jnp.float32, -lim2, lim2)
    b2 = jax.random.uniform(k4, (hidden_size,), jnp.float32, -lim2, lim2)
    g1 = jnp.ones((hidden_size,), jnp.float32)
    be1 = jnp.zeros((hidden_size,), jnp.float32)
    g2 = jnp.ones((hidden_size,), jnp.float32)
    be2 = jnp.zeros((hidden_size,), jnp.float32)
    return (w1, b1, g1, be1, w2, b2, g2, be2)


def _reference(hidden, params):
    w1, b1, g1, be1, w2, b2, g2, be2 = params

    def ln(x, g, b):
        mean = jnp.mean(x, axis=-1, keepdims=True)
        xc = x - mean
        var = jnp.mean(xc * xc, axis=-1, keepdims=True)
        return xc * jax.lax.rsqrt(var + EPS) * g + b

    h = hidden @ w1 + b1
    h = _gelu_exact(h)
    h = ln(h, g1, be1)
    h = h @ w2 + b2
    h = _gelu_exact(h)
    h = ln(h, g2, be2)
    return h


if __name__ == "__main__":
    batch, seq, input_size, hidden_size = 2, 8, 32, 32

    key = jax.random.PRNGKey(0)
    k_x, k_p = jax.random.split(key)
    hidden = jax.random.normal(k_x, (batch, seq, input_size), jnp.float32)
    params = init_params(k_p, input_size, hidden_size)

    expected = _reference(hidden, params)

    # Auto-tiled path (tm derived per chip; grid of >=2 row tiles here).
    out = mlp_with_layer_norm(hidden, params)
    jax.block_until_ready(out)
    assert out.shape == (batch, seq, hidden_size)
    assert jnp.allclose(out, expected, atol=1e-5, rtol=1e-5)

    # Explicit single-tile path (tm=16 covers all 16 rows) must match too.
    out_single = mlp_with_layer_norm(hidden, params, tm=16)
    jax.block_until_ready(out_single)
    assert jnp.allclose(out_single, expected, atol=1e-5, rtol=1e-5)

    # bf16 MXU-operand path (f32 accumulation, f32 GELU/LN): looser tolerance.
    out_bf16 = mlp_with_layer_norm(hidden, params, use_bf16_matmul=True)
    jax.block_until_ready(out_bf16)
    assert jnp.allclose(out_bf16, expected, atol=2e-1, rtol=1e-1)

    print("KERNEL_OK")
</pallas_src>

<mosaic_0001>
module attributes {stable_mosaic.version = 11 : i64} {
  func.func @_mlp_ln_kernel(%arg0: i32, %arg1: memref<8x128xf32, #tpu.memory_space<vmem>>, %arg2: memref<128x128xf32, #tpu.memory_space<vmem>>, %arg3: memref<128x128xf32, #tpu.memory_space<vmem>>, %arg4: memref<6x128xf32, #tpu.memory_space<vmem>>, %arg5: memref<8x128xf32, #tpu.memory_space<vmem>>) attributes {dimension_semantics = [#tpu.dimension_semantics<parallel>], iteration_bounds = array<i64: 2>, scalar_prefetch = 0 : i64, scratch_operands = 0 : i64, tpu.core_type = #tpu.core_type<tc>, window_params = [{transform_indices = @transform_0, window_bounds = array<i64: 8, 128>}, {pipeline_mode = #tpu.pipeline_mode<synchronous>, transform_indices = @transform_1, window_bounds = array<i64: 128, 128>}, {pipeline_mode = #tpu.pipeline_mode<synchronous>, transform_indices = @transform_2, window_bounds = array<i64: 128, 128>}, {pipeline_mode = #tpu.pipeline_mode<synchronous>, transform_indices = @transform_3, window_bounds = array<i64: 6, 128>}, {transform_indices = @transform_4, window_bounds = array<i64: 8, 128>}]} {
    %c0 = arith.constant 0 : index
    %c0_0 = arith.constant 0 : index
    %0 = vector.load %arg1[%c0, %c0_0] : memref<8x128xf32, #tpu.memory_space<vmem>>, vector<8x128xf32>
    %c0_1 = arith.constant 0 : index
    %c0_2 = arith.constant 0 : index
    %1 = vector.load %arg2[%c0_1, %c0_2] : memref<128x128xf32, #tpu.memory_space<vmem>>, vector<128x128xf32>
    %c0_3 = arith.constant 0 : index
    %c0_4 = arith.constant 0 : index
    %2 = vector.load %arg3[%c0_3, %c0_4] : memref<128x128xf32, #tpu.memory_space<vmem>>, vector<128x128xf32>
    %c0_5 = arith.constant 0 : index
    %c0_6 = arith.constant 0 : index
    %3 = vector.load %arg4[%c0_5, %c0_6] : memref<6x128xf32, #tpu.memory_space<vmem>>, vector<1x128xf32>
    %c1 = arith.constant 1 : index
    %c0_7 = arith.constant 0 : index
    %4 = vector.load %arg4[%c1, %c0_7] : memref<6x128xf32, #tpu.memory_space<vmem>>, vector<1x128xf32>
    %c2 = arith.constant 2 : index
    %c0_8 = arith.constant 0 : index
    %5 = vector.load %arg4[%c2, %c0_8] : memref<6x128xf32, #tpu.memory_space<vmem>>, vector<1x128xf32>
    %c3 = arith.constant 3 : index
    %c0_9 = arith.constant 0 : index
    %6 = vector.load %arg4[%c3, %c0_9] : memref<6x128xf32, #tpu.memory_space<vmem>>, vector<1x128xf32>
    %c4 = arith.constant 4 : index
    %c0_10 = arith.constant 0 : index
    %7 = vector.load %arg4[%c4, %c0_10] : memref<6x128xf32, #tpu.memory_space<vmem>>, vector<1x128xf32>
    %c5 = arith.constant 5 : index
    %c0_11 = arith.constant 0 : index
    %8 = vector.load %arg4[%c5, %c0_11] : memref<6x128xf32, #tpu.memory_space<vmem>>, vector<1x128xf32>
    %cst = arith.constant dense<0.000000e+00> : vector<8x128xf32>
    %9 = tpu.matmul %0, %1, %cst {dimension_numbers = #tpu.dot_dimension_numbers<[1], [0], [0], [1], [0, 0, 1, 1], [], []>} : vector<8x128xf32>, vector<128x128xf32>, vector<8x128xf32> -> vector<8x128xf32>
    %10 = vector.broadcast %3 : vector<1x128xf32> to vector<8x128xf32>
    %11 = arith.addf %9, %10 : vector<8x128xf32>
    %cst_12 = arith.constant 5.000000e-01 : f32
    %12 = vector.broadcast %cst_12 : f32 to vector<8x128xf32>
    %13 = arith.mulf %12, %11 : vector<8x128xf32>
    %cst_13 = arith.constant 2.000000e+00 : f32
    %14 = math.sqrt %cst_13 : f32
    %cst_14 = arith.constant 1.000000e+00 : f32
    %15 = arith.divf %cst_14, %14 : f32
    %16 = vector.broadcast %15 : f32 to vector<8x128xf32>
    %17 = arith.mulf %11, %16 : vector<8x128xf32>
    %18 = math.erf %17 : vector<8x128xf32>
    %cst_15 = arith.constant 1.000000e+00 : f32
    %19 = vector.broadcast %cst_15 : f32 to vector<8x128xf32>
    %20 = arith.addf %19, %18 : vector<8x128xf32>
    %21 = arith.mulf %13, %20 : vector<8x128xf32>
    %cst_16 = arith.constant dense<0.000000e+00> : vector<8xf32>
    %22 = vector.multi_reduction <add>, %21, %cst_16 [1] : vector<8x128xf32> to vector<8xf32>
    %23 = vector.shape_cast %22 : vector<8xf32> to vector<8x1xf32>
    %cst_17 = arith.constant 3.125000e-02 : f32
    %24 = vector.broadcast %cst_17 : f32 to vector<8x1xf32>
    %25 = arith.mulf %23, %24 : vector<8x1xf32>
    %26 = vector.broadcast %25 : vector<8x1xf32> to vector<8x128xf32>
    %27 = arith.subf %21, %26 : vector<8x128xf32>
    %28 = arith.mulf %27, %27 : vector<8x128xf32>
    %cst_18 = arith.constant dense<0.000000e+00> : vector<8xf32>
    %29 = vector.multi_reduction <add>, %28, %cst_18 [1] : vector<8x128xf32> to vector<8xf32>
    %30 = vector.shape_cast %29 : vector<8xf32> to vector<8x1xf32>
    %31 = arith.mulf %25, %25 : vector<8x1xf32>
    %cst_19 = arith.constant 9.600000e+01 : f32
    %32 = vector.broadcast %cst_19 : f32 to vector<8x1xf32>
    %33 = arith.mulf %32, %31 : vector<8x1xf32>
    %34 = arith.subf %30, %33 : vector<8x1xf32>
    %cst_20 = arith.constant 3.125000e-02 : f32
    %35 = vector.broadcast %cst_20 : f32 to vector<8x1xf32>
    %36 = arith.mulf %34, %35 : vector<8x1xf32>
    %cst_21 = arith.constant 9.99999996E-13 : f32
    %37 = vector.broadcast %cst_21 : f32 to vector<8x1xf32>
    %38 = arith.addf %36, %37 : vector<8x1xf32>
    %39 = math.rsqrt %38 : vector<8x1xf32>
    %40 = vector.broadcast %39 : vector<8x1xf32> to vector<8x128xf32>
    %41 = arith.mulf %27, %40 : vector<8x128xf32>
    %42 = vector.broadcast %4 : vector<1x128xf32> to vector<8x128xf32>
    %43 = arith.mulf %41, %42 : vector<8x128xf32>
    %44 = vector.broadcast %5 : vector<1x128xf32> to vector<8x128xf32>
    %45 = arith.addf %43, %44 : vector<8x128xf32>
    %cst_22 = arith.constant dense<0.000000e+00> : vector<8x128xf32>
    %46 = tpu.matmul %45, %2, %cst_22 {dimension_numbers = #tpu.dot_dimension_numbers<[1], [0], [0], [1], [0, 0, 1, 1], [], []>} : vector<8x128xf32>, vector<128x128xf32>, vector<8x128xf32> -> vector<8x128xf32>
    %47 = vector.broadcast %6 : vector<1x128xf32> to vector<8x128xf32>
    %48 = arith.addf %46, %47 : vector<8x128xf32>
    %cst_23 = arith.constant 5.000000e-01 : f32
    %49 = vector.broadcast %cst_23 : f32 to vector<8x128xf32>
    %50 = arith.mulf %49, %48 : vector<8x128xf32>
    %cst_24 = arith.constant 2.000000e+00 : f32
    %51 = math.sqrt %cst_24 : f32
    %cst_25 = arith.constant 1.000000e+00 : f32
    %52 = arith.divf %cst_25, %51 : f32
    %53 = vector.broadcast %52 : f32 to vector<8x128xf32>
    %54 = arith.mulf %48, %53 : vector<8x128xf32>
    %55 = math.erf %54 : vector<8x128xf32>
    %cst_26 = arith.constant 1.000000e+00 : f32
    %56 = vector.broadcast %cst_26 : f32 to vector<8x128xf32>
    %57 = arith.addf %56, %55 : vector<8x128xf32>
    %58 = arith.mulf %50, %57 : vector<8x128xf32>
    %cst_27 = arith.constant dense<0.000000e+00> : vector<8xf32>
    %59 = vector.multi_reduction <add>, %58, %cst_27 [1] : vector<8x128xf32> to vector<8xf32>
    %60 = vector.shape_cast %59 : vector<8xf32> to vector<8x1xf32>
    %cst_28 = arith.constant 3.125000e-02 : f32
    %61 = vector.broadcast %cst_28 : f32 to vector<8x1xf32>
    %62 = arith.mulf %60, %61 : vector<8x1xf32>
    %63 = vector.broadcast %62 : vector<8x1xf32> to vector<8x128xf32>
    %64 = arith.subf %58, %63 : vector<8x128xf32>
    %65 = arith.mulf %64, %64 : vector<8x128xf32>
    %cst_29 = arith.constant dense<0.000000e+00> : vector<8xf32>
    %66 = vector.multi_reduction <add>, %65, %cst_29 [1] : vector<8x128xf32> to vector<8xf32>
    %67 = vector.shape_cast %66 : vector<8xf32> to vector<8x1xf32>
    %68 = arith.mulf %62, %62 : vector<8x1xf32>
    %cst_30 = arith.constant 9.600000e+01 : f32
    %69 = vector.broadcast %cst_30 : f32 to vector<8x1xf32>
    %70 = arith.mulf %69, %68 : vector<8x1xf32>
    %71 = arith.subf %67, %70 : vector<8x1xf32>
    %cst_31 = arith.constant 3.125000e-02 : f32
    %72 = vector.broadcast %cst_31 : f32 to vector<8x1xf32>
    %73 = arith.mulf %71, %72 : vector<8x1xf32>
    %cst_32 = arith.constant 9.99999996E-13 : f32
    %74 = vector.broadcast %cst_32 : f32 to vector<8x1xf32>
    %75 = arith.addf %73, %74 : vector<8x1xf32>
    %76 = math.rsqrt %75 : vector<8x1xf32>
    %77 = vector.broadcast %76 : vector<8x1xf32> to vector<8x128xf32>
    %78 = arith.mulf %64, %77 : vector<8x128xf32>
    %79 = vector.broadcast %7 : vector<1x128xf32> to vector<8x128xf32>
    %80 = arith.mulf %78, %79 : vector<8x128xf32>
    %81 = vector.broadcast %8 : vector<1x128xf32> to vector<8x128xf32>
    %82 = arith.addf %80, %81 : vector<8x128xf32>
    %c0_33 = arith.constant 0 : index
    %c0_34 = arith.constant 0 : index
    %83 = vector.load %arg5[%c0_33, %c0_34] : memref<8x128xf32, #tpu.memory_space<vmem>>, vector<8x128xf32>
    tpu.vector_store %arg5[%c0_33, %c0_34], %82 {strides = array<i32>} : memref<8x128xf32, #tpu.memory_space<vmem>>, vector<8x128xf32>,
    return
  }
  func.func @transform_0(%arg0: i32) -> (i32, i32) {
    %c0_i32 = arith.constant 0 : i32
    %c0_i32_0 = arith.constant 0 : i32
    return %arg0, %c0_i32 : i32, i32
  }
  func.func @transform_1(%arg0: i32) -> (i32, i32) {
    %c0_i32 = arith.constant 0 : i32
    %c0_i32_0 = arith.constant 0 : i32
    %c0_i32_1 = arith.constant 0 : i32
    return %c0_i32, %c0_i32_0 : i32, i32
  }
  func.func @transform_2(%arg0: i32) -> (i32, i32) {
    %c0_i32 = arith.constant 0 : i32
    %c0_i32_0 = arith.constant 0 : i32
    %c0_i32_1 = arith.constant 0 : i32
    return %c0_i32, %c0_i32_0 : i32, i32
  }
  func.func @transform_3(%arg0: i32) -> (i32, i32) {
    %c0_i32 = arith.constant 0 : i32
    %c0_i32_0 = arith.constant 0 : i32
    %c0_i32_1 = arith.constant 0 : i32
    return %c0_i32, %c0_i32_0 : i32, i32
  }
  func.func @transform_4(%arg0: i32) -> (i32, i32) {
    %c0_i32 = arith.constant 0 : i32
    %c0_i32_0 = arith.constant 0 : i32
    return %arg0, %c0_i32 : i32, i32
  }
}

</mosaic_0001>

<bundles_post_ra>
// kernel: mlp_with_layer_norm.1
= control target key start
LH: loop header
LB: loop body
LE: loop exit
PB: predicated region body
PF: predicated region fallthrough
CT: control target
= control target key end

     0   :  { %s714_s15 = smov 0   ;;  %s872_s0 = inlined_call_operand.vmem [shape: f32[16,128], index: 0, kind: input, shape index: {}]   ;;  %s873_s1 = inlined_call_operand.vmem [shape: f32[128,128], index: 1, kind: input, shape index: {}]   ;;  %s874_s2 = inlined_call_operand.vmem [shape: f32[128,128], index: 2, kind: input, shape index: {}]   ;;  %s875_s3 = inlined_call_operand.vmem [shape: f32[6,128], index: 3, kind: input, shape index: {}]   ;;  %s876_s4 = inlined_call_operand.vmem [shape: f32[16,128], index: 4, kind: output, shape index: {}]  }
   0x1 LB: > { %s492_s16 = sadd.s32 4294967295, %s684_s15   ;;  %p496_p0 = scmp.ge.s32.totalorder %s684_s15, 1  ;;  %s684_s15 = sphi %s714_s15, %s14_s15  }
   0x2   : > { %p161_p1 = scmp.lt.s32.totalorder %s684_s15, 3 }
   0x4   : > { %p162_p2 = pnand %p496_p0, %p161_p1 }
   0x5   : > { %v194_v0 = vld [vmem:[%s873_s1] sm:$0xff] (!%p162_p2)  ;;  %v195_v1 = vld [vmem:[%s873_s1 + $0x8] sm:$0xff] (!%p162_p2)  ;;  %v196_v2 = vld [vmem:[%s873_s1 + $0x10] sm:$0xff] (!%p162_p2)  ;;  %v686_v3 = vmov (!%p162_p2), 0.0|0.0   ;;  %vm687_vm0 = vmmov (!%p162_p2), 0   ;;  %v688_v6 = vmov (!%p162_p2), 0.0  }
   0x6   : > { %165 = sbr.rel (%p162_p2) target bundleno = 1128 (0x468), region = 36  ;;  %611 = vmatprep.subr.bf16.mxu0 (!%p162_p2), %v686_v3  ;;  %v612_v4 = vpack.c.bf16 (!%p162_p2), %v195_v1, %v194_v0  ;;  %v197_v5 = vld [vmem:[%s873_s1 + $0x18] sm:$0xff] (!%p162_p2)  ;;  %573 = vmatprep.mubr.msk.f32.mxu0 (!%p162_p2), %vm687_vm0, %v688_v6  ;;  %v198_v8 = vld [vmem:[%s873_s1 + $0x20] sm:$0xff] (!%p162_p2)  ;;  %v199_v9 = vld [vmem:[%s873_s1 + $0x28] sm:$0xff] (!%p162_p2)  ;;  %p185_p3 = scmp.lt.s32.totalorder (!%p162_p2), %s492_s16, 1 }
   0x7   : > { %635 = vmatprep.subr.bf16.mxu1 (!%p162_p2), %v686_v3  ;;  %608 = vmatprep.mubr.msk.f32.mxu1 (!%p162_p2), %vm687_vm0, %v688_v6  ;;  %v615_v7 = vpack.c.bf16 (!%p162_p2), %v197_v5, %v196_v2  ;;  %v618_v10 = vpack.c.bf16 (!%p162_p2), %v199_v9, %v198_v8  ;;  %v200_v11 = vld [vmem:[%s873_s1 + $0x30] sm:$0xff] (!%p162_p2)  ;;  %v201_v12 = vld [vmem:[%s873_s1 + $0x38] sm:$0xff] (!%p162_p2)  ;;  %v202_v14 = vld [vmem:[%s873_s1 + $0x40] sm:$0xff] (!%p162_p2) }
   0x8   : > { %613 = vmatpush3.bf16.msra.mxu0 (!%p162_p2), %v612_v4  ;;  %v621_v13 = vpack.c.bf16 (!%p162_p2), %v201_v12, %v200_v11  ;;  %v203_v15 = vld [vmem:[%s873_s1 + $0x48] sm:$0xff] (!%p162_p2)  ;;  %v204_v17 = vld [vmem:[%s873_s1 + $0x50] sm:$0xff] (!%p162_p2)  ;;  %v205_v18 = vld [vmem:[%s873_s1 + $0x58] sm:$0xff] (!%p162_p2) }
   0x9   : > { %614 = vmatprep.subr.bf16.mxu0 (!%p162_p2), %v686_v3  ;;  %v624_v16 = vpack.c.bf16 (!%p162_p2), %v203_v15, %v202_v14  ;;  %v627_v19 = vpack.c.bf16 (!%p162_p2), %v205_v18, %v204_v17  ;;  %v206_v20 = vld [vmem:[%s873_s1 + $0x60] sm:$0xff] (!%p162_p2)  ;;  %v207_v21 = vld [vmem:[%s873_s1 + $0x68] sm:$0xff] (!%p162_p2)  ;;  %v208_v23 = vld [vmem:[%s873_s1 + $0x70] sm:$0xff] (!%p162_p2) }
   0xa   : > { %v630_v22 = vpack.c.bf16 (!%p162_p2), %v207_v21, %v206_v20  ;;  %v209_v24 = vld [vmem:[%s873_s1 + $0x78] sm:$0xff] (!%p162_p2)  ;;  %v499_v27 = vld [vmem:[%s875_s3] ss:$0 sm:$0xff] (!%p162_p2)  ;;  %v211_v37 = vld [vmem:[%s874_s2 + $0x8] sm:$0xff] (!%p162_p2) }
   0xb   : > { %v633_v25 = vpack.c.bf16 (!%p162_p2), %v209_v24, %v208_v23  ;;  %v210_v36 = vld [vmem:[%s874_s2] sm:$0xff] (!%p162_p2)  ;;  %v212_v38 = vld [vmem:[%s874_s2 + $0x10] sm:$0xff] (!%p162_p2)  ;;  %v213_v40 = vld [vmem:[%s874_s2 + $0x18] sm:$0xff] (!%p162_p2) }
   0xc   : > { %616 = vmatpush3.bf16.msra.mxu0 (!%p162_p2), %v615_v7  ;;  %v636_v39 = vpack.c.bf16 (!%p162_p2), %v211_v37, %v210_v36  ;;  %v639_v41 = vpack.c.bf16 (!%p162_p2), %v213_v40, %v212_v38  ;;  %v214_v46 = vld [vmem:[%s874_s2 + $0x20] sm:$0xff] (!%p162_p2)  ;;  %v215_v47 = vld [vmem:[%s874_s2 + $0x28] sm:$0xff] (!%p162_p2)  ;;  %v216_v49 = vld [vmem:[%s874_s2 + $0x30] sm:$0xff] (!%p162_p2) }
   0xd   : > { %617 = vmatprep.subr.bf16.mxu0 %v686_v3  ;;  %s878_s16 = smov (!%p185_p3, %s492_s16), 1  ;;  %v642_v48 = vpack.c.bf16 %v215_v47, %v214_v46  ;;  %v217_v50 = vld [vmem:[%s874_s2 + $0x38] sm:$0xff]  ;;  %v218_v52 = vld [vmem:[%s874_s2 + $0x40] sm:$0xff]  ;;  %v219_v53 = vld [vmem:[%s874_s2 + $0x48] sm:$0xff] }
   0xe   : > { %s497_s25 = sshll.u32 %s878_s16, 3  ;;  %637 = vmatpush3.bf16.msra.mxu1 %v636_v39  ;;  %v645_v51 = vpack.c.bf16 %v217_v50, %v216_v49  ;;  %v648_v54 = vpack.c.bf16 %v219_v53, %v218_v52  ;;  %v220_v55 = vld [vmem:[%s874_s2 + $0x50] sm:$0xff]  ;;  %v221_v56 = vld [vmem:[%s874_s2 + $0x58] sm:$0xff]  ;;  %v222_v58 = vld [vmem:[%s874_s2 + $0x60] sm:$0xff] }
   0xf   : > { %s188_s28 = scalar_lea.vmem %s872_s0, %s497_s25  ;;  %638 = vmatprep.subr.bf16.mxu1 %v686_v3  ;;  %v651_v57 = vpack.c.bf16 %v221_v56, %v220_v55  ;;  %v223_v59 = vld [vmem:[%s874_s2 + $0x68] sm:$0xff]  ;;  %v224_v61 = vld [vmem:[%s874_s2 + $0x70] sm:$0xff]  ;;  %v225_v62 = vld [vmem:[%s874_s2 + $0x78] sm:$0xff]  ;;  %s192_s29 = scalar_lea.vmem %s876_s4, %s497_s25 }
  0x10   : > { %619 = vmatpush3.bf16.msra.mxu0 %v618_v10  ;;  %v193_v26 = vld [vmem:[%s188_s28] sm:$0xff]  ;;  %v654_v60 = vpack.c.bf16 %v223_v59, %v222_v58  ;;  %v657_v63 = vpack.c.bf16 %v225_v62, %v224_v61 }
  0x11   : > { %620 = vmatprep.subr.bf16.mxu0 %v686_v3  ;;  %v500_v8 = vld [vmem:[%s875_s3 + $0x1] ss:$0 sm:$0xff]  ;;  %v501_v10 = vld [vmem:[%s875_s3 + $0x2] ss:$0 sm:$0xff]  ;;  %v502_v12 = vld [vmem:[%s875_s3 + $0x3] ss:$0 sm:$0xff] }
  0x12   : > { %640 = vmatpush3.bf16.msra.mxu1 %v639_v41 }
  0x13   : > { %641 = vmatprep.subr.bf16.mxu1 %v686_v3 }
  0x14   : > { %622 = vmatpush3.bf16.msra.mxu0 %v621_v13 }
  0x15   : > { %623 = vmatprep.subr.bf16.mxu0 %v686_v3 }
  0x16   : > { %643 = vmatpush3.bf16.msra.mxu1 %v642_v48 }
  0x17   : > { %644 = vmatprep.subr.bf16.mxu1 %v686_v3 }
  0x18   : > { %625 = vmatpush3.bf16.msra.mxu0 %v624_v16 }
  0x19   : > { %626 = vmatprep.subr.bf16.mxu0 %v686_v3 }
  0x1a   : > { %646 = vmatpush3.bf16.msra.mxu1 %v645_v51 }
  0x1b   : > { %647 = vmatprep.subr.bf16.mxu1 %v686_v3 }
  0x1c   : > { %628 = vmatpush3.bf16.msra.mxu0 %v627_v19 }
  0x1d   : > { %629 = vmatprep.subr.bf16.mxu0 %v686_v3 }
  0x1e   : > { %649 = vmatpush3.bf16.msra.mxu1 %v648_v54 }
  0x1f   : > { %650 = vmatprep.subr.bf16.mxu1 %v686_v3 }
  0x20   : > { %631 = vmatpush3.bf16.msra.mxu0 %v630_v22 }
  0x21   : > { %632 = vmatprep.subr.bf16.mxu0 %v686_v3 }
  0x22   : > { %652 = vmatpush3.bf16.msra.mxu1 %v651_v57 }
  0x23   : > { %653 = vmatprep.subr.bf16.mxu1 %v686_v3 }
  0x24   : > { %634 = vmatpush3.bf16.msra.mxu0 %v633_v25 }
  0x26   : > { %655 = vmatpush3.bf16.msra.mxu1 %v654_v60 }
  0x27   : > { %574 = vmatmul.mubr.f32.vlgmr.msra.gmra.mrb[0].mxu0 %v193_v26  ;;  %656 = vmatprep.subr.bf16.mxu1 %v686_v3 }
  0x2a   : > { %658 = vmatpush3.bf16.msra.mxu1 %v657_v63 }
  0xfa   : > { %v302_v28 = vpop.f32.mrb[0].mxu0 }
  0xfb   : > { %v303_v29 = vadd.f32 %v499_v27, %v302_v28  ;;  %v575_v30 = vpop.f32.mrb[1].mxu0 }
  0xfd   : > { %v307_v31 = vmul.f32 0.70710677, %v303_v29  ;;  %v306_v33 = vmul.f32 0.5, %v303_v29 }
  0xff   : > { %670 = verf.f32 %v307_v31 }
 0x109   : > { %v671_v32 = vpop.eup %670 }
 0x10a   : > { %v309_v34 = vadd.f32 1.0, %v671_v32  ;;  %v503_v32 = vld [vmem:[%s875_s3 + $0x4] ss:$0 sm:$0xff] }
 0x10c   : > { %v310_v35 = vmul.f32 %v309_v34, %v306_v33  ;;  %v504_v34 = vld [vmem:[%s875_s3 + $0x5] ss:$0 sm:$0xff] }
 0x10e   : > { %311 = vadd.xlane.f32.xlu0 %v310_v35 }
 0x19b   : > { %v312_v42 = vpop.xlane.xlu0 %311 }
 0x19c   : > { %v313_v43 = vmul.f32 0.03125, %v312_v42 }
 0x19e   : > { %v314_v44 = vsub.f32 %v310_v35, %v313_v43  ;;  %v318_v0 = vmul.f32 %v313_v43, %v313_v43 }
 0x1a0   : > { %v315_v45 = vmul.f32 %v314_v44, %v314_v44  ;;  %v319_v1 = vmul.f32 96.0, %v318_v0 }
 0x1a2   : > { %316 = vadd.xlane.f32.xlu0 %v315_v45 }
 0x22f   : > { %v317_v2 = vpop.xlane.xlu0 %316 }
 0x230   : > { %v320_v4 = vsub.f32 %v317_v2, %v319_v1 }
 0x232   : > { %v321_v5 = vmul.f32 0.03125, %v320_v4 }
 0x234   : > { %v322_v6 = vadd.f32 1e-12, %v321_v5 }
 0x236   : > { %672 = vrsqrt.f32 %v322_v6 }
 0x240   : > { %v673_v7 = vpop.eup %672 }
 0x241   : > { %v324_v9 = vmul.f32 %v673_v7, %v314_v44 }
 0x243   : > { %v329_v11 = vmul.f32 %v500_v8, %v324_v9 }
 0x245   : > { %v334_v3 = vadd.f32 %v501_v10, %v329_v11 }
 0x247   : > { %609 = vmatmul.mubr.f32.vlgmr.msra.gmra.mrb[0].mxu1 %v334_v3 }
 0x31a   : > { %v405_v13 = vpop.f32.mrb[0].mxu1 }
 0x31b   : > { %v406_v14 = vadd.f32 %v502_v12, %v405_v13  ;;  %v610_v15 = vpop.f32.mrb[1].mxu1 }
 0x31d   : > { %v410_v16 = vmul.f32 0.70710677, %v406_v14  ;;  %v409_v18 = vmul.f32 0.5, %v406_v14 }
 0x31f   : > { %674 = verf.f32 %v410_v16 }
 0x329   : > { %v675_v17 = vpop.eup %674 }
 0x32a   : > { %v412_v19 = vadd.f32 1.0, %v675_v17 }
 0x32c   : > { %v413_v20 = vmul.f32 %v412_v19, %v409_v18 }
 0x32e   : > { %414 = vadd.xlane.f32.xlu1 %v413_v20 }
 0x3bb   : > { %v415_v21 = vpop.xlane.xlu1 %414 }
 0x3bc   : > { %v416_v22 = vmul.f32 0.03125, %v415_v21 }
 0x3be   : > { %v417_v23 = vsub.f32 %v413_v20, %v416_v22  ;;  %v421_v25 = vmul.f32 %v416_v22, %v416_v22 }
 0x3c0   : > { %v418_v24 = vmul.f32 %v417_v23, %v417_v23  ;;  %v422_v26 = vmul.f32 96.0, %v421_v25 }
 0x3c2   : > { %419 = vadd.xlane.f32.xlu1 %v418_v24 }
 0x44f   : > { %v420_v27 = vpop.xlane.xlu1 %419 }
 0x450   : > { %v423_v28 = vsub.f32 %v420_v27, %v422_v26 }
 0x452   : > { %v424_v29 = vmul.f32 0.03125, %v423_v28 }
 0x454   : > { %v425_v30 = vadd.f32 1e-12, %v424_v29 }
 0x456   : > { %676 = vrsqrt.f32 %v425_v30 }
 0x460   : > { %v677_v31 = vpop.eup %676 }
 0x461   : > { %v427_v33 = vmul.f32 %v677_v31, %v417_v23 }
 0x463   : > { %v432_v35 = vmul.f32 %v503_v32, %v427_v33 }
 0x465   : > { %v437_v36 = vadd.f32 %v504_v34, %v432_v35 }
 0x467   : > { %438 = vst [vmem:[%s192_s29] sm:$0xff] %v437_v36 }
 0x468 PF: > { %s14_s15 = sadd.s32 1, %s684_s15  }
 0x469   : > { %p11_p4 = scmp.ge.s32.totalorder %s14_s15, 4  }
 0x46b   :  { %13 = sbr.rel (!%p11_p4) target bundleno = 1 (0x1), region = 66 }

</bundles_post_ra>
